<compile_context>
chip_gen: v6e
topology: v6e:2x2x1
jax: 0.10.0
libtpu: 0.0.40
codegen_flags: <defaults>
</compile_context>

<pallas_src>
import jax
import jax.numpy as jnp
from jax.experimental import pallas as pl
from jax.experimental.pallas import tpu as pltpu


# ----------------------------------------------------------------------------
# Kernel
# ----------------------------------------------------------------------------
def realnvp_kernel(masks_ref, invm_ref, w1_ref, b1_ref, w2_ref, b2_ref,
                   x_ref, y_ref, logp_ref):
    x = x_ref[...].astype(jnp.float32)            # (TB, D)
    TB, D = x.shape
    num_layers = masks_ref.shape[0]

    out = x
    logp = jnp.zeros((TB, 1), dtype=jnp.float32)

    for l in range(num_layers):                   # static unrolled layer loop
        mask = masks_ref[l]                       # (1, D)   resident, tiny
        inv = invm_ref[l]                         # (1, D)
        x_m = out * mask

        # Fused first layer of both MLPs: one (TB,D)x(D,2H) matmul + ReLU.
        h = jnp.maximum(
            jnp.dot(x_m, w1_ref[l], preferred_element_type=jnp.float32)
            + b1_ref[l], 0.0)                     # (TB, 2H) = [h_s | h_t]

        # Fused second layer (block-diagonal weights): one (TB,2H)x(2H,2D) matmul.
        st = jnp.dot(h, w2_ref[l], preferred_element_type=jnp.float32) + b2_ref[l]
        s = jnp.tanh(st[:, :D]) * inv             # scale   (TB, D)
        t = st[:, D:] * inv                       # shift   (TB, D)

        out = x_m + inv * (out * jnp.exp(s) + t)
        logp = logp + jnp.sum(s, axis=-1, keepdims=True)

    y_ref[...] = out.astype(y_ref.dtype)
    # (TB, 1) store is a masked partial store; cost is negligible vs. the
    # already-narrow (TB, D=8) y store at these feature sizes.
    logp_ref[...] = logp


# ----------------------------------------------------------------------------
# Host-side parameter packing (pure JAX, outside the kernel)
# ----------------------------------------------------------------------------
def pack_params(params):
    sw1, tw1 = params["sw1"], params["tw1"]       # (L, D, H)
    sw2, tw2 = params["sw2"], params["tw2"]       # (L, H, D)
    L, D, H = sw1.shape

    w1 = jnp.concatenate([sw1, tw1], axis=-1)                            # (L, D, 2H)
    b1 = jnp.concatenate([params["sb1"], params["tb1"]], axis=-1)        # (L, 2H)
    b1 = b1[:, None, :]                                                  # (L, 1, 2H)

    zeros = jnp.zeros((L, H, D), dtype=sw2.dtype)
    w2_top = jnp.concatenate([sw2, zeros], axis=-1)                      # (L, H, 2D)
    w2_bot = jnp.concatenate([zeros, tw2], axis=-1)                      # (L, H, 2D)
    w2 = jnp.concatenate([w2_top, w2_bot], axis=1)                       # (L, 2H, 2D)
    b2 = jnp.concatenate([params["sb2"], params["tb2"]], axis=-1)        # (L, 2D)
    b2 = b2[:, None, :]                                                  # (L, 1, 2D)

    masks = params["masks"][:, None, :].astype(jnp.float32)              # (L, 1, D)
    inv_masks = 1.0 - masks                                              # (L, 1, D)
    return masks, inv_masks, w1, b1, w2, b2


# ----------------------------------------------------------------------------
# Wrapper
# ----------------------------------------------------------------------------
def realnvp_forward(x, params, tile_batch=512):
    """x: (B, D) float32 -> (y: (B, D), log_probability: (B,))"""
    B, D = x.shape
    masks, invm, w1, b1, w2, b2 = pack_params(params)

    TB = min(B, tile_batch)
    grid = (pl.cdiv(B, TB),)

    def resident(arr):
        # Weight blocks: full array, constant block index -> stays in VMEM
        # across the batch grid (no re-DMA between consecutive steps).
        nd = arr.ndim
        return pl.BlockSpec(arr.shape, lambda i, _nd=nd: (0,) * _nd)

    y, logp = pl.pallas_call(
        realnvp_kernel,
        grid=grid,
        in_specs=[
            resident(masks), resident(invm),
            resident(w1), resident(b1),
            resident(w2), resident(b2),
            pl.BlockSpec((TB, D), lambda i: (i, 0)),
        ],
        out_specs=(pl.BlockSpec((TB, D), lambda i: (i, 0)),
                   pl.BlockSpec((TB, 1), lambda i: (i, 0))),
        out_shape=(jax.ShapeDtypeStruct((B, D), jnp.float32),
                   jax.ShapeDtypeStruct((B, 1), jnp.float32)),
        compiler_params=pltpu.CompilerParams(
            dimension_semantics=("parallel",),
            vmem_limit_bytes=32 * 1024 * 1024),   # fits v7x's 64 MiB VMEM too
    )(masks, invm, w1, b1, w2, b2, x)
    return y, jnp.squeeze(logp, axis=-1)


# ----------------------------------------------------------------------------
# Parameter init + pure-JAX reference (unfused, for correctness check)
# ----------------------------------------------------------------------------
def init_params(key, layer_dim, hidden_size, num_layers):
    """Deterministic synthetic parameters (no checkpoint loading)."""
    ks = jax.random.split(key, 8)

    def w(k, shape):
        return (0.1 * jax.random.normal(k, shape)).astype(jnp.float32)

    # Alternating binary masks (stand-in for masks.mask2).
    masks = jnp.stack([
        jnp.array([(j + l) % 2 for j in range(layer_dim)], dtype=jnp.float32)
        for l in range(num_layers)
    ])  # (L, D)

    L, D, H = num_layers, layer_dim, hidden_size
    return {
        "masks": masks,
        "sw1": w(ks[0], (L, D, H)), "sb1": w(ks[1], (L, H)),
        "sw2": w(ks[2], (L, H, D)), "sb2": w(ks[3], (L, D)),
        "tw1": w(ks[4], (L, D, H)), "tb1": w(ks[5], (L, H)),
        "tw2": w(ks[6], (L, H, D)), "tb2": w(ks[7], (L, D)),
    }


def realnvp_reference(x, params):
    """Pure-JAX reference (un-fused networks) for correctness check."""
    out = x
    logp = jnp.zeros((x.shape[0],), jnp.float32)
    L = params["masks"].shape[0]
    for l in range(L):
        mask = params["masks"][l][None, :]
        inv = 1.0 - mask
        xm = out * mask
        h = jax.nn.relu(xm @ params["sw1"][l] + params["sb1"][l])
        s = jnp.tanh(h @ params["sw2"][l] + params["sb2"][l]) * inv
        h = jax.nn.relu(xm @ params["tw1"][l] + params["tb1"][l])
        t = (h @ params["tw2"][l] + params["tb2"][l]) * inv
        out = xm + inv * (out * jnp.exp(s) + t)
        logp = logp + jnp.sum(s, axis=-1)
    return out, logp


# TODO(synk): forward_sample() / log_probability() (base MultivariateNormal
# sampling, log_prob and the inverse pass) are not part of forward() and are
# not implemented here.

if __name__ == "__main__":
    layer_dim, hidden_size, num_layers = 8, 12, 3
    batch = 8

    key = jax.random.PRNGKey(0)
    kx, kp = jax.random.split(key)
    x = jax.random.normal(kx, (batch, layer_dim), dtype=jnp.float32)
    params = init_params(kp, layer_dim, hidden_size, num_layers)

    y, logp = realnvp_forward(x, params)
    jax.block_until_ready((y, logp))

    y_ref, logp_ref = realnvp_reference(x, params)
    assert jnp.allclose(y, y_ref, atol=1e-5, rtol=1e-5)
    assert jnp.allclose(logp, logp_ref, atol=1e-5, rtol=1e-5)

    print("KERNEL_OK")
</pallas_src>

<mosaic_0001>
module attributes {stable_mosaic.version = 11 : i64} {
  func.func @realnvp_kernel(%arg0: i32, %arg1: memref<3x1x8xf32, #tpu.memory_space<vmem>>, %arg2: memref<3x1x8xf32, #tpu.memory_space<vmem>>, %arg3: memref<3x8x24xf32, #tpu.memory_space<vmem>>, %arg4: memref<3x1x24xf32, #tpu.memory_space<vmem>>, %arg5: memref<3x24x16xf32, #tpu.memory_space<vmem>>, %arg6: memref<3x1x16xf32, #tpu.memory_space<vmem>>, %arg7: memref<8x8xf32, #tpu.memory_space<vmem>>, %arg8: memref<8x8xf32, #tpu.memory_space<vmem>>, %arg9: memref<8x1xf32, #tpu.memory_space<vmem>>) attributes {dimension_semantics = [#tpu.dimension_semantics<parallel>], iteration_bounds = array<i64: 1>, scalar_prefetch = 0 : i64, scratch_operands = 0 : i64, tpu.core_type = #tpu.core_type<tc>, window_params = [{pipeline_mode = #tpu.pipeline_mode<synchronous>, transform_indices = @transform_0, window_bounds = array<i64: 3, 1, 8>}, {pipeline_mode = #tpu.pipeline_mode<synchronous>, transform_indices = @transform_1, window_bounds = array<i64: 3, 1, 8>}, {pipeline_mode = #tpu.pipeline_mode<synchronous>, transform_indices = @transform_2, window_bounds = array<i64: 3, 8, 24>}, {pipeline_mode = #tpu.pipeline_mode<synchronous>, transform_indices = @transform_3, window_bounds = array<i64: 3, 1, 24>}, {pipeline_mode = #tpu.pipeline_mode<synchronous>, transform_indices = @transform_4, window_bounds = array<i64: 3, 24, 16>}, {pipeline_mode = #tpu.pipeline_mode<synchronous>, transform_indices = @transform_5, window_bounds = array<i64: 3, 1, 16>}, {transform_indices = @transform_6, window_bounds = array<i64: 8, 8>}, {transform_indices = @transform_7, window_bounds = array<i64: 8, 8>}, {transform_indices = @transform_8, window_bounds = array<i64: 8, 1>}]} {
    %c0 = arith.constant 0 : index
    %c0_0 = arith.constant 0 : index
    %0 = vector.load %arg7[%c0, %c0_0] : memref<8x8xf32, #tpu.memory_space<vmem>>, vector<8x8xf32>
    %cst = arith.constant 0.000000e+00 : f32
    %1 = vector.broadcast %cst : f32 to vector<8x1xf32>
    %c0_1 = arith.constant 0 : index
    %c0_2 = arith.constant 0 : index
    %c0_3 = arith.constant 0 : index
    %2 = vector.load %arg1[%c0_1, %c0_2, %c0_3] : memref<3x1x8xf32, #tpu.memory_space<vmem>>, vector<1x1x8xf32>
    %3 = vector.shape_cast %2 : vector<1x1x8xf32> to vector<1x8xf32>
    %c0_4 = arith.constant 0 : index
    %c0_5 = arith.constant 0 : index
    %c0_6 = arith.constant 0 : index
    %4 = vector.load %arg2[%c0_4, %c0_5, %c0_6] : memref<3x1x8xf32, #tpu.memory_space<vmem>>, vector<1x1x8xf32>
    %5 = vector.shape_cast %4 : vector<1x1x8xf32> to vector<1x8xf32>
    %6 = vector.broadcast %3 : vector<1x8xf32> to vector<8x8xf32>
    %7 = arith.mulf %0, %6 : vector<8x8xf32>
    %c0_7 = arith.constant 0 : index
    %c0_8 = arith.constant 0 : index
    %c0_9 = arith.constant 0 : index
    %8 = vector.load %arg3[%c0_7, %c0_8, %c0_9] : memref<3x8x24xf32, #tpu.memory_space<vmem>>, vector<1x8x24xf32>
    %9 = vector.shape_cast %8 : vector<1x8x24xf32> to vector<8x24xf32>
    %cst_10 = arith.constant dense<0.000000e+00> : vector<8x24xf32>
    %10 = tpu.matmul %7, %9, %cst_10 {dimension_numbers = #tpu.dot_dimension_numbers<[1], [0], [0], [1], [0, 0, 1, 1], [], []>} : vector<8x8xf32>, vector<8x24xf32>, vector<8x24xf32> -> vector<8x24xf32>
    %c0_11 = arith.constant 0 : index
    %c0_12 = arith.constant 0 : index
    %c0_13 = arith.constant 0 : index
    %11 = vector.load %arg4[%c0_11, %c0_12, %c0_13] : memref<3x1x24xf32, #tpu.memory_space<vmem>>, vector<1x1x24xf32>
    %12 = vector.shape_cast %11 : vector<1x1x24xf32> to vector<1x24xf32>
    %13 = vector.broadcast %12 : vector<1x24xf32> to vector<8x24xf32>
    %14 = arith.addf %10, %13 : vector<8x24xf32>
    %cst_14 = arith.constant 0.000000e+00 : f32
    %15 = vector.broadcast %cst_14 : f32 to vector<8x24xf32>
    %16 = arith.maximumf %14, %15 : vector<8x24xf32>
    %c0_15 = arith.constant 0 : index
    %c0_16 = arith.constant 0 : index
    %c0_17 = arith.constant 0 : index
    %17 = vector.load %arg5[%c0_15, %c0_16, %c0_17] : memref<3x24x16xf32, #tpu.memory_space<vmem>>, vector<1x24x16xf32>
    %18 = vector.shape_cast %17 : vector<1x24x16xf32> to vector<24x16xf32>
    %cst_18 = arith.constant dense<0.000000e+00> : vector<8x16xf32>
    %19 = tpu.matmul %16, %18, %cst_18 {dimension_numbers = #tpu.dot_dimension_numbers<[1], [0], [0], [1], [0, 0, 1, 1], [], []>} : vector<8x24xf32>, vector<24x16xf32>, vector<8x16xf32> -> vector<8x16xf32>
    %c0_19 = arith.constant 0 : index
    %c0_20 = arith.constant 0 : index
    %c0_21 = arith.constant 0 : index
    %20 = vector.load %arg6[%c0_19, %c0_20, %c0_21] : memref<3x1x16xf32, #tpu.memory_space<vmem>>, vector<1x1x16xf32>
    %21 = vector.shape_cast %20 : vector<1x1x16xf32> to vector<1x16xf32>
    %22 = vector.broadcast %21 : vector<1x16xf32> to vector<8x16xf32>
    %23 = arith.addf %19, %22 : vector<8x16xf32>
    %24 = vector.extract_strided_slice %23 {offsets = [0, 0], sizes = [8, 8], strides = [1, 1]} : vector<8x16xf32> to vector<8x8xf32>
    %25 = math.tanh %24 : vector<8x8xf32>
    %26 = vector.broadcast %5 : vector<1x8xf32> to vector<8x8xf32>
    %27 = arith.mulf %25, %26 : vector<8x8xf32>
    %28 = vector.extract_strided_slice %23 {offsets = [0, 8], sizes = [8, 8], strides = [1, 1]} : vector<8x16xf32> to vector<8x8xf32>
    %29 = vector.broadcast %5 : vector<1x8xf32> to vector<8x8xf32>
    %30 = arith.mulf %28, %29 : vector<8x8xf32>
    %31 = math.exp %27 : vector<8x8xf32>
    %32 = arith.mulf %0, %31 : vector<8x8xf32>
    %33 = arith.addf %32, %30 : vector<8x8xf32>
    %34 = vector.broadcast %5 : vector<1x8xf32> to vector<8x8xf32>
    %35 = arith.mulf %34, %33 : vector<8x8xf32>
    %36 = arith.addf %7, %35 : vector<8x8xf32>
    %cst_22 = arith.constant dense<0.000000e+00> : vector<8xf32>
    %37 = vector.multi_reduction <add>, %27, %cst_22 [1] : vector<8x8xf32> to vector<8xf32>
    %38 = vector.shape_cast %37 : vector<8xf32> to vector<8x1xf32>
    %39 = arith.addf %1, %38 : vector<8x1xf32>
    %c1 = arith.constant 1 : index
    %c0_23 = arith.constant 0 : index
    %c0_24 = arith.constant 0 : index
    %40 = vector.load %arg1[%c1, %c0_23, %c0_24] : memref<3x1x8xf32, #tpu.memory_space<vmem>>, vector<1x1x8xf32>
    %41 = vector.shape_cast %40 : vector<1x1x8xf32> to vector<1x8xf32>
    %c1_25 = arith.constant 1 : index
    %c0_26 = arith.constant 0 : index
    %c0_27 = arith.constant 0 : index
    %42 = vector.load %arg2[%c1_25, %c0_26, %c0_27] : memref<3x1x8xf32, #tpu.memory_space<vmem>>, vector<1x1x8xf32>
    %43 = vector.shape_cast %42 : vector<1x1x8xf32> to vector<1x8xf32>
    %44 = vector.broadcast %41 : vector<1x8xf32> to vector<8x8xf32>
    %45 = arith.mulf %36, %44 : vector<8x8xf32>
    %c1_28 = arith.constant 1 : index
    %c0_29 = arith.constant 0 : index
    %c0_30 = arith.constant 0 : index
    %46 = vector.load %arg3[%c1_28, %c0_29, %c0_30] : memref<3x8x24xf32, #tpu.memory_space<vmem>>, vector<1x8x24xf32>
    %47 = vector.shape_cast %46 : vector<1x8x24xf32> to vector<8x24xf32>
    %cst_31 = arith.constant dense<0.000000e+00> : vector<8x24xf32>
    %48 = tpu.matmul %45, %47, %cst_31 {dimension_numbers = #tpu.dot_dimension_numbers<[1], [0], [0], [1], [0, 0, 1, 1], [], []>} : vector<8x8xf32>, vector<8x24xf32>, vector<8x24xf32> -> vector<8x24xf32>
    %c1_32 = arith.constant 1 : index
    %c0_33 = arith.constant 0 : index
    %c0_34 = arith.constant 0 : index
    %49 = vector.load %arg4[%c1_32, %c0_33, %c0_34] : memref<3x1x24xf32, #tpu.memory_space<vmem>>, vector<1x1x24xf32>
    %50 = vector.shape_cast %49 : vector<1x1x24xf32> to vector<1x24xf32>
    %51 = vector.broadcast %50 : vector<1x24xf32> to vector<8x24xf32>
    %52 = arith.addf %48, %51 : vector<8x24xf32>
    %cst_35 = arith.constant 0.000000e+00 : f32
    %53 = vector.broadcast %cst_35 : f32 to vector<8x24xf32>
    %54 = arith.maximumf %52, %53 : vector<8x24xf32>
    %c1_36 = arith.constant 1 : index
    %c0_37 = arith.constant 0 : index
    %c0_38 = arith.constant 0 : index
    %55 = vector.load %arg5[%c1_36, %c0_37, %c0_38] : memref<3x24x16xf32, #tpu.memory_space<vmem>>, vector<1x24x16xf32>
    %56 = vector.shape_cast %55 : vector<1x24x16xf32> to vector<24x16xf32>
    %cst_39 = arith.constant dense<0.000000e+00> : vector<8x16xf32>
    %57 = tpu.matmul %54, %56, %cst_39 {dimension_numbers = #tpu.dot_dimension_numbers<[1], [0], [0], [1], [0, 0, 1, 1], [], []>} : vector<8x24xf32>, vector<24x16xf32>, vector<8x16xf32> -> vector<8x16xf32>
    %c1_40 = arith.constant 1 : index
    %c0_41 = arith.constant 0 : index
    %c0_42 = arith.constant 0 : index
    %58 = vector.load %arg6[%c1_40, %c0_41, %c0_42] : memref<3x1x16xf32, #tpu.memory_space<vmem>>, vector<1x1x16xf32>
    %59 = vector.shape_cast %58 : vector<1x1x16xf32> to vector<1x16xf32>
    %60 = vector.broadcast %59 : vector<1x16xf32> to vector<8x16xf32>
    %61 = arith.addf %57, %60 : vector<8x16xf32>
    %62 = vector.extract_strided_slice %61 {offsets = [0, 0], sizes = [8, 8], strides = [1, 1]} : vector<8x16xf32> to vector<8x8xf32>
    %63 = math.tanh %62 : vector<8x8xf32>
    %64 = vector.broadcast %43 : vector<1x8xf32> to vector<8x8xf32>
    %65 = arith.mulf %63, %64 : vector<8x8xf32>
    %66 = vector.extract_strided_slice %61 {offsets = [0, 8], sizes = [8, 8], strides = [1, 1]} : vector<8x16xf32> to vector<8x8xf32>
    %67 = vector.broadcast %43 : vector<1x8xf32> to vector<8x8xf32>
    %68 = arith.mulf %66, %67 : vector<8x8xf32>
    %69 = math.exp %65 : vector<8x8xf32>
    %70 = arith.mulf %36, %69 : vector<8x8xf32>
    %71 = arith.addf %70, %68 : vector<8x8xf32>
    %72 = vector.broadcast %43 : vector<1x8xf32> to vector<8x8xf32>
    %73 = arith.mulf %72, %71 : vector<8x8xf32>
    %74 = arith.addf %45, %73 : vector<8x8xf32>
    %cst_43 = arith.constant dense<0.000000e+00> : vector<8xf32>
    %75 = vector.multi_reduction <add>, %65, %cst_43 [1] : vector<8x8xf32> to vector<8xf32>
    %76 = vector.shape_cast %75 : vector<8xf32> to vector<8x1xf32>
    %77 = arith.addf %39, %76 : vector<8x1xf32>
    %c2 = arith.constant 2 : index
    %c0_44 = arith.constant 0 : index
    %c0_45 = arith.constant 0 : index
    %78 = vector.load %arg1[%c2, %c0_44, %c0_45] : memref<3x1x8xf32, #tpu.memory_space<vmem>>, vector<1x1x8xf32>
    %79 = vector.shape_cast %78 : vector<1x1x8xf32> to vector<1x8xf32>
    %c2_46 = arith.constant 2 : index
    %c0_47 = arith.constant 0 : index
    %c0_48 = arith.constant 0 : index
    %80 = vector.load %arg2[%c2_46, %c0_47, %c0_48] : memref<3x1x8xf32, #tpu.memory_space<vmem>>, vector<1x1x8xf32>
    %81 = vector.shape_cast %80 : vector<1x1x8xf32> to vector<1x8xf32>
    %82 = vector.broadcast %79 : vector<1x8xf32> to vector<8x8xf32>
    %83 = arith.mulf %74, %82 : vector<8x8xf32>
    %c2_49 = arith.constant 2 : index
    %c0_50 = arith.constant 0 : index
    %c0_51 = arith.constant 0 : index
    %84 = vector.load %arg3[%c2_49, %c0_50, %c0_51] : memref<3x8x24xf32, #tpu.memory_space<vmem>>, vector<1x8x24xf32>
    %85 = vector.shape_cast %84 : vector<1x8x24xf32> to vector<8x24xf32>
    %cst_52 = arith.constant dense<0.000000e+00> : vector<8x24xf32>
    %86 = tpu.matmul %83, %85, %cst_52 {dimension_numbers = #tpu.dot_dimension_numbers<[1], [0], [0], [1], [0, 0, 1, 1], [], []>} : vector<8x8xf32>, vector<8x24xf32>, vector<8x24xf32> -> vector<8x24xf32>
    %c2_53 = arith.constant 2 : index
    %c0_54 = arith.constant 0 : index
    %c0_55 = arith.constant 0 : index
    %87 = vector.load %arg4[%c2_53, %c0_54, %c0_55] : memref<3x1x24xf32, #tpu.memory_space<vmem>>, vector<1x1x24xf32>
    %88 = vector.shape_cast %87 : vector<1x1x24xf32> to vector<1x24xf32>
    %89 = vector.broadcast %88 : vector<1x24xf32> to vector<8x24xf32>
    %90 = arith.addf %86, %89 : vector<8x24xf32>
    %cst_56 = arith.constant 0.000000e+00 : f32
    %91 = vector.broadcast %cst_56 : f32 to vector<8x24xf32>
    %92 = arith.maximumf %90, %91 : vector<8x24xf32>
    %c2_57 = arith.constant 2 : index
    %c0_58 = arith.constant 0 : index
    %c0_59 = arith.constant 0 : index
    %93 = vector.load %arg5[%c2_57, %c0_58, %c0_59] : memref<3x24x16xf32, #tpu.memory_space<vmem>>, vector<1x24x16xf32>
    %94 = vector.shape_cast %93 : vector<1x24x16xf32> to vector<24x16xf32>
    %cst_60 = arith.constant dense<0.000000e+00> : vector<8x16xf32>
    %95 = tpu.matmul %92, %94, %cst_60 {dimension_numbers = #tpu.dot_dimension_numbers<[1], [0], [0], [1], [0, 0, 1, 1], [], []>} : vector<8x24xf32>, vector<24x16xf32>, vector<8x16xf32> -> vector<8x16xf32>
    %c2_61 = arith.constant 2 : index
    %c0_62 = arith.constant 0 : index
    %c0_63 = arith.constant 0 : index
    %96 = vector.load %arg6[%c2_61, %c0_62, %c0_63] : memref<3x1x16xf32, #tpu.memory_space<vmem>>, vector<1x1x16xf32>
    %97 = vector.shape_cast %96 : vector<1x1x16xf32> to vector<1x16xf32>
    %98 = vector.broadcast %97 : vector<1x16xf32> to vector<8x16xf32>
    %99 = arith.addf %95, %98 : vector<8x16xf32>
    %100 = vector.extract_strided_slice %99 {offsets = [0, 0], sizes = [8, 8], strides = [1, 1]} : vector<8x16xf32> to vector<8x8xf32>
    %101 = math.tanh %100 : vector<8x8xf32>
    %102 = vector.broadcast %81 : vector<1x8xf32> to vector<8x8xf32>
    %103 = arith.mulf %101, %102 : vector<8x8xf32>
    %104 = vector.extract_strided_slice %99 {offsets = [0, 8], sizes = [8, 8], strides = [1, 1]} : vector<8x16xf32> to vector<8x8xf32>
    %105 = vector.broadcast %81 : vector<1x8xf32> to vector<8x8xf32>
    %106 = arith.mulf %104, %105 : vector<8x8xf32>
    %107 = math.exp %103 : vector<8x8xf32>
    %108 = arith.mulf %74, %107 : vector<8x8xf32>
    %109 = arith.addf %108, %106 : vector<8x8xf32>
    %110 = vector.broadcast %81 : vector<1x8xf32> to vector<8x8xf32>
    %111 = arith.mulf %110, %109 : vector<8x8xf32>
    %112 = arith.addf %83, %111 : vector<8x8xf32>
    %cst_64 = arith.constant dense<0.000000e+00> : vector<8xf32>
    %113 = vector.multi_reduction <add>, %103, %cst_64 [1] : vector<8x8xf32> to vector<8xf32>
    %114 = vector.shape_cast %113 : vector<8xf32> to vector<8x1xf32>
    %115 = arith.addf %77, %114 : vector<8x1xf32>
    %c0_65 = arith.constant 0 : index
    %c0_66 = arith.constant 0 : index
    %116 = vector.load %arg8[%c0_65, %c0_66] : memref<8x8xf32, #tpu.memory_space<vmem>>, vector<8x8xf32>
    tpu.vector_store %arg8[%c0_65, %c0_66], %112 {strides = array<i32>} : memref<8x8xf32, #tpu.memory_space<vmem>>, vector<8x8xf32>,
    %c0_67 = arith.constant 0 : index
    %c0_68 = arith.constant 0 : index
    %117 = vector.load %arg9[%c0_67, %c0_68] : memref<8x1xf32, #tpu.memory_space<vmem>>, vector<8x1xf32>
    tpu.vector_store %arg9[%c0_67, %c0_68], %115 {strides = array<i32>} : memref<8x1xf32, #tpu.memory_space<vmem>>, vector<8x1xf32>,
    return
  }
  func.func @transform_0(%arg0: i32) -> (i32, i32, i32) {
    %c0_i32 = arith.constant 0 : i32
    %c0_i32_0 = arith.constant 0 : i32
    %c0_i32_1 = arith.constant 0 : i32
    %c0_i32_2 = arith.constant 0 : i32
    return %c0_i32, %c0_i32_0, %c0_i32_1 : i32, i32, i32
  }
  func.func @transform_1(%arg0: i32) -> (i32, i32, i32) {
    %c0_i32 = arith.constant 0 : i32
    %c0_i32_0 = arith.constant 0 : i32
    %c0_i32_1 = arith.constant 0 : i32
    %c0_i32_2 = arith.constant 0 : i32
    return %c0_i32, %c0_i32_0, %c0_i32_1 : i32, i32, i32
  }
  func.func @transform_2(%arg0: i32) -> (i32, i32, i32) {
    %c0_i32 = arith.constant 0 : i32
    %c0_i32_0 = arith.constant 0 : i32
    %c0_i32_1 = arith.constant 0 : i32
    %c0_i32_2 = arith.constant 0 : i32
    return %c0_i32, %c0_i32_0, %c0_i32_1 : i32, i32, i32
  }
  func.func @transform_3(%arg0: i32) -> (i32, i32, i32) {
    %c0_i32 = arith.constant 0 : i32
    %c0_i32_0 = arith.constant 0 : i32
    %c0_i32_1 = arith.constant 0 : i32
    %c0_i32_2 = arith.constant 0 : i32
    return %c0_i32, %c0_i32_0, %c0_i32_1 : i32, i32, i32
  }
  func.func @transform_4(%arg0: i32) -> (i32, i32, i32) {
    %c0_i32 = arith.constant 0 : i32
    %c0_i32_0 = arith.constant 0 : i32
    %c0_i32_1 = arith.constant 0 : i32
    %c0_i32_2 = arith.constant 0 : i32
    return %c0_i32, %c0_i32_0, %c0_i32_1 : i32, i32, i32
  }
  func.func @transform_5(%arg0: i32) -> (i32, i32, i32) {
    %c0_i32 = arith.constant 0 : i32
    %c0_i32_0 = arith.constant 0 : i32
    %c0_i32_1 = arith.constant 0 : i32
    %c0_i32_2 = arith.constant 0 : i32
    return %c0_i32, %c0_i32_0, %c0_i32_1 : i32, i32, i32
  }
  func.func @transform_6(%arg0: i32) -> (i32, i32) {
    %c0_i32 = arith.constant 0 : i32
    %c0_i32_0 = arith.constant 0 : i32
    return %arg0, %c0_i32 : i32, i32
  }
  func.func @transform_7(%arg0: i32) -> (i32, i32) {
    %c0_i32 = arith.constant 0 : i32
    %c0_i32_0 = arith.constant 0 : i32
    return %arg0, %c0_i32 : i32, i32
  }
  func.func @transform_8(%arg0: i32) -> (i32, i32) {
    %c0_i32 = arith.constant 0 : i32
    %c0_i32_0 = arith.constant 0 : i32
    return %arg0, %c0_i32 : i32, i32
  }
}

</mosaic_0001>

<bundles_post_ra>
// kernel: tpu_custom_call.1
= control target key start
LH: loop header
LB: loop body
LE: loop exit
PB: predicated region body
PF: predicated region fallthrough
CT: control target
= control target key end

     0   :  { %v798_v3 = vmov 0.0   ;;  %vm799_vm0 = vmmov 0   ;;  %vm47_vm1 = vcmask 64512   ;;  %s974_s0 = inlined_call_operand.vmem [shape: f32[3,1,8], index: 0, kind: input, shape index: {}]   ;;  %s975_s1 = inlined_call_operand.vmem [shape: f32[3,1,8], index: 1, kind: input, shape index: {}]   ;;  %s976_s2 = inlined_call_operand.vmem [shape: f32[3,8,24], index: 2, kind: input, shape index: {}]   ;;  %s977_s3 = inlined_call_operand.vmem [shape: f32[3,1,24], index: 3, kind: input, shape index: {}]   ;;  %s978_s4 = inlined_call_operand.vmem [shape: f32[3,24,16], index: 4, kind: input, shape index: {}]   ;;  %s979_s5 = inlined_call_operand.vmem [shape: f32[3,1,16], index: 5, kind: input, shape index: {}]   ;;  %s980_s6 = inlined_call_operand.vmem [shape: f32[8,8], index: 6, kind: input, shape index: {}]   ;;  %s981_s7 = inlined_call_operand.hbm [shape: f32[8,8], index: 7, kind: output, shape index: {0}]   ;;  %s982_s8 = inlined_call_operand.vmem [shape: f32[8,1], index: 8, kind: output, shape index: {1}]  }
   0x1   :  { %v39_v0 = vld [vmem:[%s976_s2] sm:$0xff]  ;;  %717 = vmatprep.subr.mxu0 %v798_v3  ;;  %719 = vmatprep.mubr.msk.f32.mxu0 %vm799_vm0, %v798_v3 }
   0x2   :  { %v29_v1 = vld [vmem:[%s980_s6] sm:$0xff] }
   0x3   :  { %v665_v2 = vld [vmem:[%s974_s0] ss:$0 sm:$0xff] }
   0x4   :  { %v38_v4 = vmul.f32 %v665_v2, %v29_v1 }
   0x5   :  { %14 = vsyncpa [#allocation3], 0  ;;  %718 = vmatpush3.msra.mxu0 %v39_v0  ;;  %722 = vmatprep.subr.mxu1 %v798_v3  ;;  %v124_v5 = vld [vmem:[%s978_s4 + $0x10] sm:$0xff]  ;;  %v123_v6 = vld [vmem:[%s978_s4 + $0x8] sm:$0xff]  ;;  %s800_s18 = smov 8   ;;  %vm132_vm2 = vcmask 195584  }
   0x6   :  { %720 = vmatmul.mubr.msk.f32.vlgmr.msra.gmra.mxu0 %vm47_vm1, %v38_v4  ;;  %728 = vmatprep.mubr.msk.f32.mxu1 %vm799_vm0, %v798_v3  ;;  %v122_v7 = vld [vmem:[%s978_s4] sm:$0xff]  ;;  %v674_v15 = vld [vmem:[%s976_s2 + $0x8] sm:$0xff]  ;;  %s801_s25 = smov 120   ;;  %v678_v34 = vld [vmem:[%s978_s4 + $0x18] sm:$0xff] }
   0x7   :  { %731 = vmatprep.subr.mxu0 %v798_v3  ;;  %733 = vmatprep.mubr.msk.f32.mxu0 %vm799_vm0, %v798_v3  ;;  %v670_v8 = vld [vmem:[%s975_s1] ss:$0 sm:$0xff]  ;;  %v673_v29 = vld [vmem:[%s974_s0 + $0x1] ss:$0 sm:$0xff]  ;;  %v680_v32 = vld [vmem:[%s978_s4 + $0x28] sm:$0xff] }
   0x8   :  { %723 = vmatpush3.msra.mxu1 %v124_v5  ;;  %214 = vrot.lane.b32.xlu0 %v670_v8, %s800_s18  ;;  %v666_v9 = vld [vmem:[%s977_s3] ss:$0 sm:$0xff]  ;;  %v684_v35 = vld [vmem:[%s975_s1 + $0x1] ss:$0 sm:$0xff]  ;;  %v920_v36 = vld [vmem:[%s975_s1 + $0x2] ss:$0 sm:$0xff] }
   0x9   :  { %724 = vmatprep.subr.mxu1 %v798_v3  ;;  %v668_v14 = vld [vmem:[%s979_s5] ss:$0 sm:$0xff]  ;;  %732 = vmatpush3.msra.mxu0 %v674_v15  ;;  %v676_v37 = vld [vmem:[%s977_s3 + $0x1] ss:$0 sm:$0xff]  ;;  %v688_v43 = vld [vmem:[%s976_s2 + $0x10] sm:$0xff] }
   0xa   :  { %725 = vmatpush3.msra.mxu1 %v123_v6  ;;  %736 = vmatprep.subr.mxu0 %v798_v3  ;;  %v679_v33 = vld [vmem:[%s978_s4 + $0x20] sm:$0xff]  ;;  %v693_v63 = vld [vmem:[%s978_s4 + $0x38] sm:$0xff]  ;;  %v692_v0 = vld [vmem:[%s978_s4 + $0x30] sm:$0xff] }
   0xb   :  { %726 = vmatprep.subr.mxu1 %v798_v3  ;;  %420 = vrot.lane.b32.xlu1 %v684_v35, %s800_s18  ;;  %v682_v42 = vld [vmem:[%s979_s5 + $0x1] ss:$0 sm:$0xff]  ;;  %v687_v59 = vld [vmem:[%s974_s0 + $0x2] ss:$0 sm:$0xff] }
   0xc   :  { %727 = vmatpush3.msra.mxu1 %v122_v7  ;;  %v694_v62 = vld [vmem:[%s978_s4 + $0x40] sm:$0xff] }
   0xd   :  { %745 = vmatprep.subr.mxu1 %v798_v3  ;;  %v696_v7 = vld [vmem:[%s979_s5 + $0x2] ss:$0 sm:$0xff] }
  0x7a   :  { %v215_v17 = vpop.permute.xlu0 %214 }
  0x7d   :  { %v421_v45 = vpop.permute.xlu1 %420 }
  0xc6   :  { %v117_v10 = vpop.f32.mrf.mxu0 }
  0xc7   :  { %v118_v11 = vadd.f32 %v666_v9, %v117_v10 }
  0xc8   :  { %v721_v12 = vpop.f32.mrf.mxu0 }
  0xc9   :  { %v121_v13 = vmax.f32 %v118_v11, 0.0 }
  0xcb   :  { %729 = vmatmul.mubr.msk.f32.vlgmr.msra.gmra.mxu1 %vm132_vm2, %v121_v13 }
  0xcc   :  { %747 = vmatprep.mubr.msk.f32.mxu1 %vm799_vm0, %v798_v3  ;;  %746 = vmatpush3.msra.mxu1 %v688_v43 }
  0xcd   :  { %750 = vmatprep.subr.mxu1 %v798_v3 }
 0x18b   :  { %v202_v16 = vpop.f32.mrf.mxu1 }
 0x18c   :  { %v203_v18 = vadd.f32 %v668_v14, %v202_v16 }
 0x18d   :  { %v730_v19 = vpop.f32.mrf.mxu1 }
 0x18e   :  { %v217_v20 = vmul.f32 %v215_v17, %v203_v18  ;;  %764 = vtanh.f32 %v203_v18 }
 0x190   :  { %222 = vrot.lane.b32.xlu0 %v217_v20, %s801_s25 }
 0x194   :  { %626 = vrot.lane.b32.xlu0 %v920_v36, %s800_s18 }
 0x19b   :  { %v765_v21 = vpop.eup %764 }
 0x19c   :  { %v213_v22 = vmul.f32 %v765_v21, %v670_v8 }
 0x19e   :  { %v218_v23 = vmul.f32 1.442695, %v213_v22  ;;  %v228_v52 = vsel %vm47_vm1, %v213_v22, 0.0 }
 0x1a0   :  { %766 = vpow2.f32 %v218_v23 }
 0x1ad   :  { %v767_v24 = vpop.eup %766 }
 0x1ae   :  { %v220_v25 = vmul.f32 %v767_v24, %v29_v1  ;;  %v690_v1 = vld [vmem:[%s977_s3 + $0x2] ss:$0 sm:$0xff]  ;;  %s802_s3 = smov [#allocation2]  }
 0x1af   :  { %s653_s4 = sshll.u32 %s802_s3, 4  ;;  %s654_s4 = int_to_ptr.vmem [resolvable:$true] %s653_s4 }
 0x1b0   :  { %s776_s5 = scalar_lea.vmem %s654_s4, 128  ;;  %p781_p1 = scmp.lt.s32.totalorder %s654_s4, %s654_s4 }
 0x1b1   :  { %p777_p0 = scmp.ne.s32.totalorder %s654_s4, %s776_s5  ;;  %p782_p2 = scmp.lt.s32.totalorder %s776_s5, %s776_s5 }
 0x1b3   :  { %p783_p3 = por %p782_p2, %p781_p1 }
 0x1b5   :  { %p784_p4 = pnand %p783_p3, %p777_p0 }
 0x202   :  { %v223_v26 = vpop.permute.xlu0 %222 }
 0x203   :  { %v225_v27 = vadd.f32 %v223_v26, %v220_v25 }
 0x205   :  { %v226_v28 = vmul.f32 %v670_v8, %v225_v27 }
 0x206   :  { %v627_v9 = vpop.permute.xlu0 %626 }
 0x207   :  { %v227_v30 = vadd.f32 %v226_v28, %v38_v4 }
 0x209   :  { %v242_v31 = vmul.f32 %v673_v29, %v227_v30 }
 0x20b   :  { %734 = vmatmul.mubr.msk.f32.vlgmr.msra.gmra.mxu0 %vm47_vm1, %v242_v31 }
 0x20c   :  { %742 = vmatprep.mubr.msk.f32.mxu0 %vm799_vm0, %v798_v3  ;;  %737 = vmatpush3.msra.mxu0 %v680_v32 }
 0x20d   :  { %738 = vmatprep.subr.mxu0 %v798_v3 }
 0x20e   :  { %739 = vmatpush3.msra.mxu0 %v679_v33 }
 0x20f   :  { %740 = vmatprep.subr.mxu0 %v798_v3 }
 0x210   :  { %741 = vmatpush3.msra.mxu0 %v678_v34 }
 0x2cb   :  { %v322_v38 = vpop.f32.mrf.mxu0 }
 0x2cc   :  { %v323_v39 = vadd.f32 %v676_v37, %v322_v38 }
 0x2cd   :  { %v735_v40 = vpop.f32.mrf.mxu0 }
 0x2ce   :  { %v326_v41 = vmax.f32 %v323_v39, 0.0 }
 0x2d0   :  { %743 = vmatmul.mubr.msk.f32.vlgmr.msra.gmra.mxu0 %vm132_vm2, %v326_v41 }
 0x390   :  { %v408_v44 = vpop.f32.mrf.mxu0 }
 0x391   :  { %v409_v46 = vadd.f32 %v682_v42, %v408_v44 }
 0x392   :  { %v744_v47 = vpop.f32.mrf.mxu0 }
 0x393   :  { %768 = vtanh.f32 %v409_v46  ;;  %v423_v48 = vmul.f32 %v421_v45, %v409_v46 }
 0x395   :  { %428 = vrot.lane.b32.xlu1 %v423_v48, %s801_s25 }
 0x3a0   :  { %v769_v49 = vpop.eup %768 }
 0x3a1   :  { %v419_v50 = vmul.f32 %v769_v49, %v684_v35 }
 0x3a3   :  { %v434_v51 = vsel %vm47_vm1, %v419_v50, 0.0  ;;  %v424_v53 = vmul.f32 1.442695, %v419_v50 }
 0x3a4   :  { %435 = vadd.xlane.f32.xlu0 %v434_v51 }
 0x3a5   :  { %770 = vpow2.f32 %v424_v53 }
 0x3b2   :  { %v771_v54 = vpop.eup %770 }
 0x3b3   :  { %v426_v55 = vmul.f32 %v771_v54, %v227_v30 }
 0x3b9   :  { %229 = vadd.xlane.f32.xlu1 %v228_v52 }
 0x407   :  { %v429_v56 = vpop.permute.xlu1 %428 }
 0x408   :  { %v431_v57 = vadd.f32 %v429_v56, %v426_v55 }
 0x40a   :  { %v432_v58 = vmul.f32 %v684_v35, %v431_v57 }
 0x40c   :  { %v433_v60 = vadd.f32 %v432_v58, %v242_v31 }
 0x40e   :  { %v448_v61 = vmul.f32 %v687_v59, %v433_v60 }
 0x410   :  { %748 = vmatmul.mubr.msk.f32.vlgmr.msra.gmra.mxu1 %vm47_vm1, %v448_v61 }
 0x411   :  { %756 = vmatprep.mubr.msk.f32.mxu1 %vm799_vm0, %v798_v3  ;;  %751 = vmatpush3.msra.mxu1 %v694_v62 }
 0x412   :  { %752 = vmatprep.subr.mxu1 %v798_v3 }
 0x413   :  { %753 = vmatpush3.msra.mxu1 %v693_v63 }
 0x414   :  { %754 = vmatprep.subr.mxu1 %v798_v3 }
 0x415   :  { %755 = vmatpush3.msra.mxu1 %v692_v0 }
 0x442   :  { %v230_v17 = vpop.xlane.xlu1 %229 }
 0x4d0   :  { %v528_v2 = vpop.f32.mrf.mxu1 }
 0x4d1   :  { %v529_v4 = vadd.f32 %v690_v1, %v528_v2 }
 0x4d2   :  { %v749_v5 = vpop.f32.mrf.mxu1 }
 0x4d3   :  { %v532_v6 = vmax.f32 %v529_v4, 0.0 }
 0x4d5   :  { %757 = vmatmul.mubr.msk.f32.vlgmr.msra.gmra.mxu1 %vm132_vm2, %v532_v6 }
 0x595   :  { %v614_v3 = vpop.f32.mrf.mxu1 }
 0x596   :  { %v615_v8 = vadd.f32 %v696_v7, %v614_v3 }
 0x597   :  { %v758_v10 = vpop.f32.mrf.mxu1 }
 0x598   :  { %772 = vtanh.f32 %v615_v8  ;;  %v629_v11 = vmul.f32 %v627_v9, %v615_v8 }
 0x59a   :  { %634 = vrot.lane.b32.xlu1 %v629_v11, %s801_s25 }
 0x5a5   :  { %v773_v12 = vpop.eup %772 }
 0x5a6   :  { %v625_v13 = vmul.f32 %v773_v12, %v920_v36 }
 0x5a8   :  { %v640_v14 = vsel %vm47_vm1, %v625_v13, 0.0  ;;  %v630_v15 = vmul.f32 1.442695, %v625_v13 }
 0x5a9   :  { %641 = vadd.xlane.f32.xlu0 %v640_v14 }
 0x5aa   :  { %774 = vpow2.f32 %v630_v15 }
 0x5b7   :  { %v775_v16 = vpop.eup %774 }
 0x5b8   :  { %v632_v18 = vmul.f32 %v775_v16, %v433_v60 }
 0x60c   :  { %v635_v19 = vpop.permute.xlu1 %634 }
 0x60d   :  { %v637_v20 = vadd.f32 %v635_v19, %v632_v18 }
 0x60f   :  { %v638_v21 = vmul.f32 %v920_v36, %v637_v20 }
 0x611   :  { %v639_v22 = vadd.f32 %v638_v21, %v448_v61 }
 0x613   :  { %644 = vst.msk [vmem:[#allocation2] sm:$0xff] %vm47_vm1, %v639_v22 }
 0x614   :  { %787 = shalt.err (!%p784_p4)
}
 0x615   :  { %656 = dma.vmem_to_hbm [thread:$0]  %s654_s4, 128, %s981_s7, [#allocation3]   ;;  %v436_v23 = vpop.xlane.xlu0 %435  ;;  %vm645_vm3 = vcmask 7168  }
 0x616   :  { %v437_v24 = vadd.f32 %v436_v23, %v230_v17 }
 0x632   :  { %v642_v25 = vpop.xlane.xlu0 %641 }
 0x633   :  { %v643_v26 = vadd.f32 %v642_v25, %v437_v24 }
 0x635   :  { %646 = vst.msk [vmem:[%s982_s8] sm:$0xff] %vm645_vm3, %v643_v26 }
 0x636   :  { %796 = dma.done.wait [#allocation3], 128  }
 0x637   :  { %797 = vsyncadd [#allocation3], 4294967168 }
 0x638   :  { %664 = vsyncpa [#allocation3], 1 }

</bundles_post_ra>
